<compile_context>
chip_gen: v6e
topology: v6e:2x2x1
jax: 0.10.0
libtpu: 0.0.40
codegen_flags: <defaults>
</compile_context>

<pallas_src>
import functools

import jax
import jax.numpy as jnp
from jax.experimental import pallas as pl
from jax.experimental.pallas import tpu as pltpu


def _round_up(x, m):
    return (x + m - 1) // m * m


# ------------------------------- the kernel --------------------------------

def prenorm_kernel(x_ref, w_ref, b_ref, o_ref, *, d_valid, eps):
    x = x_ref[0].astype(jnp.float32)   # (TN, Dp)
    w = w_ref[0].astype(jnp.float32)   # (1, Dp)  effective LN weight (folds 1+scale)
    b = b_ref[0].astype(jnp.float32)   # (1, Dp)  effective LN bias   (folds shift)

    dp = x.shape[-1]
    inv_d = 1.0 / d_valid

    # Pad lanes (if any) are zero-filled by the wrapper, so the sum needs no mask.
    mean = jnp.sum(x, axis=-1, keepdims=True) * inv_d
    xc = x - mean
    if d_valid != dp:  # static: only emitted for the ragged-D fallback path
        lane = jax.lax.broadcasted_iota(jnp.int32, (1, dp), 1)
        xc = jnp.where(lane < d_valid, xc, 0.0)
    var = jnp.sum(xc * xc, axis=-1, keepdims=True) * inv_d
    inv_std = jax.lax.rsqrt(var + eps)            # EUP rsqrt (free slot)

    o_ref[0] = (xc * inv_std * w + b).astype(o_ref.dtype)


# ------------------------------ python wrapper ------------------------------

def prenorm_pallas(x, shift, scale, ln_w, ln_b, *, eps=1e-5, max_row_tile=1024):
    B, N, D = x.shape
    out_dtype = x.dtype
    f32 = jnp.float32

    # Fold modulate into the LayerNorm affine (tiny (B, D) op, negligible HBM):
    #   modulate(LN(x), shift, scale) = xc*inv_std*[w*(1+scale)] + [b*(1+scale)+shift]
    one_p_scale = 1.0 + scale.astype(f32)
    w_eff = ln_w.astype(f32)[None, :] * one_p_scale                       # (B, D)
    b_eff = ln_b.astype(f32)[None, :] * one_p_scale + shift.astype(f32)   # (B, D)

    fast = (D % 128 == 0) and (N % 8 == 0)
    if fast:
        Dp, Np = D, N
        x_in = x                                   # zero-copy fast path
    else:
        Dp = _round_up(max(D, 128), 128)
        Np = _round_up(N, 8)
        x_in = jnp.pad(x, ((0, 0), (0, Np - N), (0, Dp - D)))
        w_eff = jnp.pad(w_eff, ((0, 0), (0, Dp - D)))
        b_eff = jnp.pad(b_eff, ((0, 0), (0, Dp - D)))
    w_eff = w_eff[:, None, :]                      # (B, 1, Dp)
    b_eff = b_eff[:, None, :]                      # (B, 1, Dp)

    # --- row-tile (TN) selection: VMEM budget, megacore, divisibility ---
    x_bytes = jnp.dtype(x_in.dtype).itemsize
    o_bytes = jnp.dtype(out_dtype).itemsize
    per_row = 2 * Dp * (x_bytes + o_bytes)         # double-buffered in + out
    budget = 32 << 20                              # safe even on v7x (64 MiB/TC)

    tn = min(max_row_tile, Np)
    tn = max(8, (min(tn, budget // per_row) // 8) * 8)
    # v7x megacore: make sure each of the two TCs gets >= 2 blocks when possible
    while tn > 8 and B * pl.cdiv(Np, tn) < 4:
        tn = max(8, ((tn // 2) // 8) * 8)
    # snap tile so it divides the (8-aligned) sequence length
    while Np % tn:
        tn -= 8
    n_tiles = Np // tn

    needed = per_row * tn + 2 * 2 * Dp * 4 + (1 << 20)
    vmem_limit = int(min(48 << 20, max(32 << 20, needed * 3 // 2)))

    kern = functools.partial(prenorm_kernel, d_valid=D, eps=eps)
    out = pl.pallas_call(
        kern,
        out_shape=jax.ShapeDtypeStruct((B, Np, Dp), out_dtype),
        grid=(B, n_tiles),
        in_specs=[
            pl.BlockSpec((1, tn, Dp), lambda bi, ni: (bi, ni, 0)),  # x tile
            pl.BlockSpec((1, 1, Dp), lambda bi, ni: (bi, 0, 0)),    # w_eff (per batch)
            pl.BlockSpec((1, 1, Dp), lambda bi, ni: (bi, 0, 0)),    # b_eff (per batch)
        ],
        out_specs=pl.BlockSpec((1, tn, Dp), lambda bi, ni: (bi, ni, 0)),
        compiler_params=pltpu.CompilerParams(
            dimension_semantics=("parallel", "parallel"),
            vmem_limit_bytes=vmem_limit,
        ),
    )(x_in, w_eff, b_eff)

    if fast:
        return out
    return out[:, :N, :D]


def prenorm_forward(x, shift, scale, ln_w, ln_b, fn=None, *, eps=1e-5):
    """PreNorm.forward: fn(modulate(LayerNorm(x), shift, scale))."""
    y = prenorm_pallas(x, shift, scale, ln_w, ln_b, eps=eps)
    # TODO(synk): `fn` is the injected sub-module (not defined in the spec);
    # when provided as a JAX callable it is applied here.
    return y if fn is None else fn(y)


# ----------------------- pure-JAX reference (checking) ----------------------

def prenorm_reference(x, shift, scale, ln_w, ln_b, eps=1e-5):
    xf = x.astype(jnp.float32)
    mean = jnp.mean(xf, axis=-1, keepdims=True)
    var = jnp.mean((xf - mean) ** 2, axis=-1, keepdims=True)
    xn = (xf - mean) * jax.lax.rsqrt(var + eps) * ln_w + ln_b
    out = xn * (1.0 + scale[:, None, :]) + shift[:, None, :]
    return out.astype(x.dtype)


# ---------------------------------- main ------------------------------------

if __name__ == "__main__":
    key = jax.random.PRNGKey(0)

    def run_case(B, N, D, key):
        kx, ks, kc, kw, kb = jax.random.split(key, 5)
        x = jax.random.normal(kx, (B, N, D), jnp.float32)
        shift = 0.5 * jax.random.normal(ks, (B, D), jnp.float32)
        scale = 0.5 * jax.random.normal(kc, (B, D), jnp.float32)
        ln_w = 1.0 + 0.1 * jax.random.normal(kw, (D,), jnp.float32)
        ln_b = 0.1 * jax.random.normal(kb, (D,), jnp.float32)

        out = jax.block_until_ready(prenorm_forward(x, shift, scale, ln_w, ln_b))
        ref = jax.block_until_ready(prenorm_reference(x, shift, scale, ln_w, ln_b))
        if not jnp.allclose(out, ref, atol=1e-4, rtol=1e-4):
            raise AssertionError(
                f"mismatch at ({B},{N},{D}): "
                f"max abs diff = {float(jnp.max(jnp.abs(out - ref)))}")

    k1, k2 = jax.random.split(key)
    run_case(2, 8, 32, k1)     # ragged D -> padded fallback path
    run_case(2, 16, 128, k2)   # lane-aligned D, 8-aligned N -> zero-copy fast path
    print("KERNEL_OK")
</pallas_src>

<mosaic_0001>
module attributes {stable_mosaic.version = 11 : i64} {
  func.func @prenorm_kernel(%arg0: i32, %arg1: i32, %arg2: memref<1x8x128xf32, #tpu.memory_space<vmem>>, %arg3: memref<1x1x128xf32, #tpu.memory_space<vmem>>, %arg4: memref<1x1x128xf32, #tpu.memory_space<vmem>>, %arg5: memref<1x8x128xf32, #tpu.memory_space<vmem>>) attributes {dimension_semantics = [#tpu.dimension_semantics<parallel>, #tpu.dimension_semantics<parallel>], iteration_bounds = array<i64: 2, 1>, scalar_prefetch = 0 : i64, scratch_operands = 0 : i64, tpu.core_type = #tpu.core_type<tc>, window_params = [{transform_indices = @transform_0, window_bounds = array<i64: 1, 8, 128>}, {transform_indices = @transform_1, window_bounds = array<i64: 1, 1, 128>}, {transform_indices = @transform_2, window_bounds = array<i64: 1, 1, 128>}, {transform_indices = @transform_3, window_bounds = array<i64: 1, 8, 128>}]} {
    %c0 = arith.constant 0 : index
    %c0_0 = arith.constant 0 : index
    %c0_1 = arith.constant 0 : index
    %0 = vector.load %arg2[%c0, %c0_0, %c0_1] : memref<1x8x128xf32, #tpu.memory_space<vmem>>, vector<1x8x128xf32>
    %1 = vector.shape_cast %0 : vector<1x8x128xf32> to vector<8x128xf32>
    %c0_2 = arith.constant 0 : index
    %c0_3 = arith.constant 0 : index
    %c0_4 = arith.constant 0 : index
    %2 = vector.load %arg3[%c0_2, %c0_3, %c0_4] : memref<1x1x128xf32, #tpu.memory_space<vmem>>, vector<1x1x128xf32>
    %3 = vector.shape_cast %2 : vector<1x1x128xf32> to vector<1x128xf32>
    %c0_5 = arith.constant 0 : index
    %c0_6 = arith.constant 0 : index
    %c0_7 = arith.constant 0 : index
    %4 = vector.load %arg4[%c0_5, %c0_6, %c0_7] : memref<1x1x128xf32, #tpu.memory_space<vmem>>, vector<1x1x128xf32>
    %5 = vector.shape_cast %4 : vector<1x1x128xf32> to vector<1x128xf32>
    %cst = arith.constant dense<0.000000e+00> : vector<8xf32>
    %6 = vector.multi_reduction <add>, %1, %cst [1] : vector<8x128xf32> to vector<8xf32>
    %7 = vector.shape_cast %6 : vector<8xf32> to vector<8x1xf32>
    %cst_8 = arith.constant 3.125000e-02 : f32
    %8 = vector.broadcast %cst_8 : f32 to vector<8x1xf32>
    %9 = arith.mulf %7, %8 : vector<8x1xf32>
    %10 = vector.broadcast %9 : vector<8x1xf32> to vector<8x128xf32>
    %11 = arith.subf %1, %10 : vector<8x128xf32>
    %12 = tpu.iota {dimensions = array<i32: 1>} : vector<1x128xi32>
    %c32_i32 = arith.constant 32 : i32
    %13 = vector.broadcast %c32_i32 : i32 to vector<1x128xi32>
    %14 = arith.cmpi slt, %12, %13 : vector<1x128xi32>
    %cst_9 = arith.constant 0.000000e+00 : f32
    %15 = vector.shape_cast %14 : vector<1x128xi1> to vector<1x128xi1>
    %16 = vector.broadcast %15 : vector<1x128xi1> to vector<8x128xi1>
    %17 = vector.broadcast %cst_9 : f32 to vector<8x128xf32>
    %18 = arith.select %16, %11, %17 : vector<8x128xi1>, vector<8x128xf32>
    %19 = arith.mulf %18, %18 : vector<8x128xf32>
    %cst_10 = arith.constant dense<0.000000e+00> : vector<8xf32>
    %20 = vector.multi_reduction <add>, %19, %cst_10 [1] : vector<8x128xf32> to vector<8xf32>
    %21 = vector.shape_cast %20 : vector<8xf32> to vector<8x1xf32>
    %cst_11 = arith.constant 3.125000e-02 : f32
    %22 = vector.broadcast %cst_11 : f32 to vector<8x1xf32>
    %23 = arith.mulf %21, %22 : vector<8x1xf32>
    %cst_12 = arith.constant 9.99999974E-6 : f32
    %24 = vector.broadcast %cst_12 : f32 to vector<8x1xf32>
    %25 = arith.addf %23, %24 : vector<8x1xf32>
    %26 = math.rsqrt %25 : vector<8x1xf32>
    %27 = vector.broadcast %26 : vector<8x1xf32> to vector<8x128xf32>
    %28 = arith.mulf %18, %27 : vector<8x128xf32>
    %29 = vector.broadcast %3 : vector<1x128xf32> to vector<8x128xf32>
    %30 = arith.mulf %28, %29 : vector<8x128xf32>
    %31 = vector.broadcast %5 : vector<1x128xf32> to vector<8x128xf32>
    %32 = arith.addf %30, %31 : vector<8x128xf32>
    %c0_13 = arith.constant 0 : index
    %c0_14 = arith.constant 0 : index
    %c0_15 = arith.constant 0 : index
    %33 = vector.load %arg5[%c0_13, %c0_14, %c0_15] : memref<1x8x128xf32, #tpu.memory_space<vmem>>, vector<1x8x128xf32>
    %34 = vector.shape_cast %33 : vector<1x8x128xf32> to vector<8x128xf32>
    %35 = vector.shape_cast %32 : vector<8x128xf32> to vector<1x8x128xf32>
    tpu.vector_store %arg5[%c0_13, %c0_14, %c0_15], %35 {strides = array<i32>} : memref<1x8x128xf32, #tpu.memory_space<vmem>>, vector<1x8x128xf32>,
    return
  }
  func.func @transform_0(%arg0: i32, %arg1: i32) -> (i32, i32, i32) {
    %c0_i32 = arith.constant 0 : i32
    %c0_i32_0 = arith.constant 0 : i32
    return %arg0, %arg1, %c0_i32 : i32, i32, i32
  }
  func.func @transform_1(%arg0: i32, %arg1: i32) -> (i32, i32, i32) {
    %c0_i32 = arith.constant 0 : i32
    %c0_i32_0 = arith.constant 0 : i32
    %c0_i32_1 = arith.constant 0 : i32
    return %arg0, %c0_i32, %c0_i32_0 : i32, i32, i32
  }
  func.func @transform_2(%arg0: i32, %arg1: i32) -> (i32, i32, i32) {
    %c0_i32 = arith.constant 0 : i32
    %c0_i32_0 = arith.constant 0 : i32
    %c0_i32_1 = arith.constant 0 : i32
    return %arg0, %c0_i32, %c0_i32_0 : i32, i32, i32
  }
  func.func @transform_3(%arg0: i32, %arg1: i32) -> (i32, i32, i32) {
    %c0_i32 = arith.constant 0 : i32
    %c0_i32_0 = arith.constant 0 : i32
    return %arg0, %arg1, %c0_i32 : i32, i32, i32
  }
}

</mosaic_0001>

<bundles_post_ra>
// kernel: tpu_custom_call.1
= control target key start
LH: loop header
LB: loop body
LE: loop exit
PB: predicated region body
PF: predicated region fallthrough
CT: control target
= control target key end

     0   :  { %8 = vsyncpa [#allocation3], 0  ;;  %s833_s0 = inlined_call_operand.hbm [shape: f32[2,8,128], index: 0, kind: input, shape index: {}]   ;;  %s834_s1 = inlined_call_operand.hbm [shape: f32[2,1,128], index: 1, kind: input, shape index: {}]   ;;  %s835_s2 = inlined_call_operand.vmem [shape: f32[2,1,128], index: 2, kind: input, shape index: {}]   ;;  %s836_s3 = inlined_call_operand.hbm [shape: f32[2,8,128], index: 3, kind: output, shape index: {}]  }
   0x1   :  { %10 = vsyncpa [#allocation3 + $0x1], 0 }
   0x2   :  { %11 = vsyncpa [#allocation6], 0 }
   0x3   :  { %13 = vsyncpa [#allocation6 + $0x1], 0 }
   0x4   :  { %14 = vsyncpa [#allocation4], 0 }
   0x5   :  { %16 = vsyncpa [#allocation4 + $0x1], 0  ;;  %s660_s12 = smov 0   ;;  %s662_s13 = smov 0  }
   0x6   :  { %s664_s14 = smov 0   ;;  %s666_s15 = smov 0  }
   0x7   :  { %s668_s16 = smov 0   ;;  %s670_s17 = smov 0  }
   0x8 LB: > { %s410_s18 = sadd.s32 4294967295, %s635_s17   ;;  %s411_s19 = sadd.s32 4294967294, %s635_s17   ;;  %s635_s17 = sphi %s670_s17, %s22_s17   ;;  %s631_s16 = sphi %s668_s16, %s848_s16   ;;  %s627_s15 = sphi %s666_s15, %s847_s15   ;;  %s623_s14 = sphi %s664_s14, %s846_s14   ;;  %s619_s13 = sphi %s662_s13, %s845_s13   ;;  %s615_s12 = sphi %s660_s12, %s844_s12  }
   0x9   : > { %s34_s20 = sadd.s32 1, %s631_s16  ;;  %s43_s21 = sadd.s32 1, %s623_s14 }
   0xa   : > { %p36_p0 = scmp.ge.s32.totalorder %s34_s20, 2  ;;  %p50_p1 = scmp.ne.s32.totalorder %s623_s14, %s619_s13 }
   0xb   : > { %p51_p2 = scmp.eq.s32.totalorder %s635_s17, 0  ;;  %p56_p3 = scmp.ne.s32.totalorder %s619_s13, %s615_s12 }
   0xc   : > { %s850_s20 = smov (%p36_p0, %s34_s20), 0  ;;  %p57_p5 = scmp.eq.s32.totalorder %s410_s18, 0 }
   0xd   : > { %p701_p4 = por %p51_p2, %p50_p1  ;;  %s38_s23 = ssub.s32 %s631_s16, %s850_s20 }
   0xe   : > { %p134_p6 = scmp.eq.s32.totalorder %s410_s18, 1  ;;  %p41_p7 = scmp.eq.s32.totalorder %s38_s23, 0 }
   0xf   : > { %p707_p8 = por %p57_p5, %p56_p3  ;;  %p140_p10 = scmp.eq.s32.totalorder %s411_s19, 1 }
  0x10   : > { %p711_p9 = por %p134_p6, %p50_p1  ;;  %p443_p13 = scmp.lt.s32.totalorder %s635_s17, 2 }
  0x11   : > { %s716_s26 = scalar_select %p41_p7, %s623_s14, %s43_s21  }
  0x12   : > { %p718_p11 = por %p140_p10, %p56_p3  ;;  %s725_s28 = sand.u32 1, %s623_s14  }
  0x13   : > { %s414_s29 = sshll.u32 %s725_s28, 3  ;;  %s415_s30 = sshll.u32 %s631_s16, 7 }
  0x14   : > { %s170_s6 = scalar_lea.hbm %s833_s0, %s415_s30  ;;  %s164_s7 = scalar_lea.vmem [#allocation2], %s414_s29 }
  0x15   : > { %s172_s8 = sshll.u32 %s164_s7, 4  ;;  %p734_p0 = pnand %p443_p13, %p701_p4  ;;  %s173_s8 = int_to_ptr.vmem [resolvable:$true] %s172_s8 }
  0x16   : > { %p417_p1 = scmp.ge.s32.totalorder %s635_s17, 1  ;;  %p200_p2 = scmp.lt.s32.totalorder %s635_s17, 3 }
  0x17   : > { %s161_s10 = scalar_lea.sflag [#allocation3], %s725_s28  ;;  %p497_p3 = pneg %p734_p0 }
  0x18   : > { %s508_s11 = scalar_lea.vmem %s173_s8, 128  ;;  %s637_s18 = smov [#allocation2]  }
  0x19   : > { %p509_p5 = scmp.ne.s32.totalorder %s173_s8, %s508_s11  ;;  %s513_s19 = sshll.u32 %s637_s18, 4  ;;  %s514_s19 = int_to_ptr.vmem [resolvable:$false] %s513_s19 }
  0x1a   : > { %s515_s21 = scalar_lea.vmem %s514_s19, 256  ;;  %p516_p4 = scmp.lt.s32.totalorder %s173_s8, %s514_s19 }
  0x1b   : > { %p511_p6 = pnand %p509_p5, %p497_p3  ;;  %p517_p10 = scmp.lt.s32.totalorder %s515_s21, %s508_s11 }
  0x1d   : > { %p512_p7 = pneg %p511_p6  ;;  %p518_p13 = por %p517_p10, %p516_p4 }
  0x1f   : > { %p519_p12 = pnand %p518_p13, %p512_p7 }
  0x21   : > { %522 = shalt.err (!%p519_p12)
}
  0x22   : > { %435 = dma.hbm_to_vmem [thread:$0]  (!%p734_p0), %s170_s6, 128, %s173_s8, %s161_s10  }
  0x23   : > { %p752_p5 = pnand %p417_p1, %p200_p2  ;;  %s416_s23 = sshll.u32 %s631_s16, 4 }
  0x24   : > { %s182_s29 = scalar_lea.vmem [#allocation5], %s725_s28  ;;  %s187_s7 = scalar_lea.hbm %s834_s1, %s416_s23 }
  0x25   : > { %s189_s30 = sshll.u32 %s182_s29, 4  ;;  %s180_s11 = scalar_lea.sflag [#allocation6], %s725_s28  ;;  %s190_s30 = int_to_ptr.vmem [resolvable:$true] %s189_s30 }
  0x26   : > { %s536_s18 = scalar_lea.vmem %s190_s30, 16  ;;  %s638_s6 = smov [#allocation5]  }
  0x27   : > { %p537_p12 = scmp.ne.s32.totalorder %s190_s30, %s536_s18  ;;  %s541_s8 = sshll.u32 %s638_s6, 4  ;;  %s542_s8 = int_to_ptr.vmem [resolvable:$false] %s541_s8 }
  0x28   : > { %s543_s10 = scalar_lea.vmem %s542_s8, 32  ;;  %p544_p1 = scmp.lt.s32.totalorder %s190_s30, %s542_s8 }
  0x29   : > { %p539_p6 = pnand %p537_p12, %p497_p3  ;;  %p545_p2 = scmp.lt.s32.totalorder %s543_s10, %s536_s18 }
  0x2b   : > { %p540_p7 = pneg %p539_p6  ;;  %p546_p4 = por %p545_p2, %p544_p1 }
  0x2d   : > { %p547_p10 = pnand %p546_p4, %p540_p7 }
  0x2f   : > { %550 = shalt.err (!%p547_p10)
}
  0x30   : > { %438 = dma.hbm_to_vmem [thread:$0]  (!%p734_p0), %s187_s7, 16, %s190_s30, %s180_s11  }
  0x31   : > { %204 = sbr.rel (%p752_p5) target bundleno = 378 (0x17a), region = 32  ;;  %s770_s28 = sand.u32 (!%p752_p5), 1, %s619_s13  }
  0x32   : > { %s418_s19 = sshll.u32 (!%p752_p5), %s770_s28, 3  ;;  %s207_s21 = scalar_lea.sflag (!%p752_p5), [#allocation3], %s770_s28 }
  0x33   : > { %s210_s23 = scalar_lea.vmem (!%p752_p5), [#allocation2], %s418_s19 }
  0x36   : > { %602 = dma.done.wait (%p707_p8), %s207_s21, 128  }
  0x37   : > { %604 = vsyncadd (%p707_p8), %s207_s21, 4294967168  ;;  %s216_s9 = scalar_lea.sflag [#allocation6], %s770_s28  ;;  %s218_s22 = scalar_lea.vmem [#allocation5], %s770_s28 }
  0x38   : > { %606 = dma.done.wait (%p707_p8), %s216_s9, 16  }
  0x39   : > { %608 = vsyncadd (%p707_p8), %s216_s9, 4294967280  ;;  %v251_v0 = vld [vmem:[%s210_s23] sm:$0xff]  ;;  %v258_v1 = vlaneseq  ;;  %p248_p8 = scmp.lt.s32.totalorder %s627_s15, 1  ;;  %s423_s5 = sshll.u32 %s627_s15, 7 }
  0x3a   : > { %254 = vadd.xlane.f32.xlu0 %v251_v0  ;;  %v420_v12 = vld [vmem:[%s218_s22] ss:$0 sm:$0xff]  ;;  %s247_s7 = scalar_lea.vmem [#allocation7], %s418_s19  ;;  %s299_s8 = scalar_lea.hbm %s836_s3, %s423_s5 }
  0x3b   : > { %v259_v2 = vand.u32 127, %v258_v1  ;;  %s249_s24 = scalar_select %p248_p8, %s627_s15, 1 }
  0x3c   : > { %s301_s11 = sshll.u32 %s247_s7, 4  ;;  %s287_s10 = scalar_lea.sflag [#allocation4], %s770_s28  ;;  %s302_s11 = int_to_ptr.vmem [resolvable:$true] %s301_s11 }
  0x3d   : > { %vm260_vm0 = vcmp.lt.s32.totalorder %v259_v2, 32  ;;  %s250_s4 = scalar_lea.vmem %s835_s2, %s249_s24  ;;  %s551_s21 = scalar_lea.vmem %s302_s11, 128 }
  0x3e   : > { %v421_v14 = vld [vmem:[%s250_s4] ss:$0 sm:$0xff]  ;;  %p552_p0 = scmp.ne.s32.totalorder %s302_s11, %s551_s21  ;;  %s639_s23 = smov [#allocation7]  }
  0x3f   : > { %s555_s9 = sshll.u32 %s639_s23, 4  ;;  %s556_s9 = int_to_ptr.vmem [resolvable:$false] %s555_s9 }
  0x40   : > { %p553_p3 = pnand %p552_p0, %p711_p9  ;;  %s557_s15 = scalar_lea.vmem %s556_s9, 256 }
  0x41   : > { %p558_p5 = scmp.lt.s32.totalorder %s302_s11, %s556_s9  ;;  %p559_p12 = scmp.lt.s32.totalorder %s557_s15, %s551_s21 }
  0x42   : > { %p554_p13 = pneg %p553_p3 }
  0x43   : > { %p560_p6 = por %p559_p12, %p558_p5 }
  0x45   : > { %p561_p7 = pnand %p560_p6, %p554_p13 }
  0xc3   : > { %v255_v3 = vpop.xlane.xlu0 %254 }
  0xc4   : > { %v256_v4 = vmul.f32 0.03125, %v255_v3 }
  0xc6   : > { %v257_v5 = vsub.f32 %v251_v0, %v256_v4 }
  0xc8   : > { %v263_v6 = vsel %vm260_vm0, %v257_v5, 0.0 }
  0xc9   : > { %v264_v7 = vmul.f32 %v263_v6, %v263_v6 }
  0xcb   : > { %265 = vadd.xlane.f32.xlu0 %v264_v7 }
 0x154   : > { %v266_v8 = vpop.xlane.xlu0 %265 }
 0x155   : > { %v267_v9 = vmul.f32 0.03125, %v266_v8 }
 0x157   : > { %v268_v10 = vadd.f32 1e-05, %v267_v9 }
 0x159   : > { %493 = vrsqrt.f32 %v268_v10 }
 0x166   : > { %v494_v11 = vpop.eup %493 }
 0x167   : > { %v270_v13 = vmul.f32 %v494_v11, %v263_v6 }
 0x169   : > { %v277_v15 = vmul.f32 %v420_v12, %v270_v13 }
 0x16b   : > { %v284_v16 = vadd.f32 %v421_v14, %v277_v15 }
 0x16d   : > { %285 = vst [vmem:[%s247_s7] sm:$0xff] %v284_v16 }
 0x16e   : > { %564 = shalt.err (!%p561_p7)
}
 0x16f   : > { %s565_s19 = scalar_lea.hbm %s299_s8, 128  ;;  %s569_s24 = scalar_lea.hbm %s836_s3, 256 }
 0x170   : > { %p566_p1 = scmp.ne.s32.totalorder %s299_s8, %s565_s19  ;;  %p570_p10 = scmp.lt.s32.totalorder %s299_s8, %s836_s3 }
 0x171   : > { %p571_p8 = scmp.lt.s32.totalorder %s569_s24, %s565_s19 }
 0x172   : > { %p567_p2 = pnand %p566_p1, %p711_p9 }
 0x173   : > { %p572_p0 = por %p571_p8, %p570_p10 }
 0x174   : > { %p568_p4 = pneg %p567_p2 }
 0x176   : > { %p573_p3 = pnand %p572_p0, %p568_p4 }
 0x178   : > { %576 = shalt.err (!%p573_p3)
}
 0x179   : > { %430 = dma.vmem_to_hbm [thread:$0]  (%p711_p9), %s302_s11, 128, %s299_s8, %s287_s10  }
 0x17a PF: > { %s313_s4 = sand.u32 1, %s615_s12   ;;  %p843_p13 = scmp.ge.s32.totalorder %s635_s17, 2 }
 0x17b   : > { %s314_s5 = scalar_lea.sflag [#allocation4], %s313_s4 }
 0x17c   : > { %p440_p5 = pnand %p843_p13, %p718_p11 }
 0x17e   : > { %p441_p12 = pneg %p440_p5 }
 0x180   : > { %610 = dma.done.wait (%p441_p12), %s314_s5, 128  }
 0x181   : > { %612 = vsyncadd (%p441_p12), %s314_s5, 4294967168  ;;  %s22_s17 = sadd.s32 1, %s635_s17   ;;  %s844_s12 = smov %s619_s13 }
 0x182   : > { %p19_p6 = scmp.ge.s32.totalorder %s22_s17, 4   ;;  %s845_s13 = smov %s623_s14 }
 0x183   : > { %s846_s14 = smov %s716_s26  ;;  %s847_s15 = smov %s631_s16 }
 0x184   : > { %s848_s16 = smov %s850_s20  ;;  %21 = sbr.rel (!%p19_p6) target bundleno = 8 (0x8), region = 93 }
 0x189   :  { %319 = vsyncpa [#allocation3], 1 }
 0x18a   :  { %321 = vsyncpa [#allocation3 + $0x1], 1 }
 0x18b   :  { %322 = vsyncpa [#allocation6], 1 }
 0x18c   :  { %324 = vsyncpa [#allocation6 + $0x1], 1 }
 0x18d   :  { %325 = vsyncpa [#allocation4], 1 }
 0x18e   :  { %327 = vsyncpa [#allocation4 + $0x1], 1 }

</bundles_post_ra>
